<compile_context>
chip_gen: v7x
topology: tpu7x:2x2x1
jax: 0.10.0
libtpu: 0.0.40
codegen_flags: <defaults>
</compile_context>

<pallas_src>
import functools

import jax
import jax.numpy as jnp
from jax import lax
from jax.experimental import pallas as pl
from jax.experimental.pallas import tpu as pltpu


def _texture_mix_kernel(tc_ref, mix_ref, tex_ref, e_ref, s_ref, out_ref, *,
                        height, width, separable, matmul_dtype):
    H, W = height, width
    HW = H * W

    x = tc_ref[0:1, :]          # (1, TN) normalized coord along width  (last texture dim)
    y = tc_ref[1:2, :]          # (1, TN) normalized coord along height

    # F.grid_sample, align_corners=False: pixel = ((coord + 1) * size - 1) / 2
    ix = ((x + 1.0) * W - 1.0) * 0.5
    iy = ((y + 1.0) * H - 1.0) * 0.5
    x0f = jnp.floor(ix)
    y0f = jnp.floor(iy)
    fx = ix - x0f
    fy = iy - y0f
    x0 = x0f.astype(jnp.int32)
    y0 = y0f.astype(jnp.int32)

    if separable:
        # Separable one-hot factors.  The iota ranges [0, W) / [0, H) only ever
        # match in-bounds corners, so zeros padding_mode is automatic.
        dx = lax.broadcasted_iota(jnp.int32, (W, 1), 0) - x0           # (W, TN)
        dy = lax.broadcasted_iota(jnp.int32, (H, 1), 0) - y0           # (H, TN)
        bx = jnp.where(dx == 0, 1.0 - fx, 0.0) + jnp.where(dx == 1, fx, 0.0)
        by = jnp.where(dy == 0, 1.0 - fy, 0.0) + jnp.where(dy == 1, fy, 0.0)
        # Outer-product expansion: b[h*W + w, n] = by[h, n] * bx[w, n].
        b = (by[:, None, :] * bx[None, :, :]).reshape(HW, by.shape[-1])
    else:
        # Dense fallback (resolution not a multiple of 8): one flat-index diff
        # compared against 0 / 1 / W / W+1.  Out-of-range corners may alias an
        # in-range flat index but their weight is already zeroed and the
        # accumulation is ADDITIVE, so the sum stays correct.
        vx0 = (x0 >= 0) & (x0 <= W - 1)
        vx1 = (x0 >= -1) & (x0 <= W - 2)
        vy0 = (y0 >= 0) & (y0 <= H - 1)
        vy1 = (y0 >= -1) & (y0 <= H - 2)
        w00 = jnp.where(vx0 & vy0, (1.0 - fx) * (1.0 - fy), 0.0)
        w01 = jnp.where(vx1 & vy0, fx * (1.0 - fy), 0.0)
        w10 = jnp.where(vx0 & vy1, (1.0 - fx) * fy, 0.0)
        w11 = jnp.where(vx1 & vy1, fx * fy, 0.0)
        d = lax.broadcasted_iota(jnp.int32, (HW, 1), 0) - (y0 * W + x0)
        b = (jnp.where(d == 0, w00, 0.0) + jnp.where(d == 1, w01, 0.0)
             + jnp.where(d == W, w10, 0.0) + jnp.where(d == W + 1, w11, 0.0))

    # sampled[t*C + c, n] = bilinear sample of texture t, channel c at point n.
    # bf16 x bf16 operands with f32 accumulation by default (matmul_dtype).
    sampled = jnp.dot(tex_ref[...], b.astype(matmul_dtype),
                      preferred_element_type=jnp.float32)

    # Expand mix weights (T, TN) -> (T*C, TN) via E[t*C + c, t] = 1, then
    # collapse the weighted per-texture channels via S[c, t*C + c] = 1.
    # TODO(synk): on v5e, if profiling shows the MXU saturating after the
    # separable B build, replace this K=8 selector matmul with a sublane
    # repeat of mix_ref (XLU/copy path has slack there).
    mix_exp = jnp.dot(e_ref[...], mix_ref[...], preferred_element_type=jnp.float32)
    out_ref[...] = jnp.dot(s_ref[...], sampled * mix_exp,
                           preferred_element_type=jnp.float32)


def texture_mix_decoder(textures, texcoord, mix_weights, *, tile_n=2048,
                        matmul_dtype=jnp.bfloat16):
    """Pallas implementation of TextureMixDecoder.forward."""
    T, C, H, W = textures.shape
    assert texcoord.shape[-1] == 2
    assert mix_weights.shape[-1] == T
    assert texcoord.shape[:-1] == mix_weights.shape[:-1]
    in_shape = texcoord.shape

    tc = texcoord.reshape(-1, 2).astype(jnp.float32)
    mw = mix_weights.reshape(-1, T).astype(jnp.float32)
    n = tc.shape[0]

    # Lane-multiple tile.  Large to amortize ~0.35us per-grid-step pipeline
    # overhead, but capped near ceil(n/2) so small/medium problems still have
    # >= 2 grid steps (v7x has 2 TensorCores; a 1-step grid idles one).
    tile_n = max(128, pl.cdiv(int(tile_n), 128) * 128)
    half_n = max(128, pl.cdiv(pl.cdiv(n, 2), 128) * 128)
    tile_n = min(tile_n, half_n)

    pad = (-n) % tile_n
    if pad:
        tc = jnp.pad(tc, ((0, pad), (0, 0)))
        mw = jnp.pad(mw, ((0, pad), (0, 0)))
    n_padded = n + pad

    # N on the lane axis for the kernel.
    tc_t = tc.T                                   # (2, n_padded)
    mw_t = mw.T                                   # (T, n_padded)

    # (T*C, H*W): tex_flat[t*C + c, h*W + w] = textures[t, c, h, w]
    tex_flat = textures.reshape(T * C, H * W).astype(matmul_dtype)

    # Constant selector matrices for the texture-mixing stage (kept f32; tiny).
    tc_idx = jnp.arange(T * C)
    e_mat = (tc_idx[:, None] // C == jnp.arange(T)[None, :]).astype(jnp.float32)   # (T*C, T)
    s_mat = (jnp.arange(C)[:, None] == tc_idx[None, :] % C).astype(jnp.float32)    # (C, T*C)

    separable = (W % 8 == 0)   # (H, W, N)->(HW, N) reshape is layout-free when W % 8 == 0
    kernel = functools.partial(_texture_mix_kernel, height=H, width=W,
                               separable=separable, matmul_dtype=matmul_dtype)
    out_t = pl.pallas_call(
        kernel,
        out_shape=jax.ShapeDtypeStruct((C, n_padded), jnp.float32),
        grid_spec=pltpu.PrefetchScalarGridSpec(
            num_scalar_prefetch=0,
            grid=(n_padded // tile_n,),
            in_specs=[
                pl.BlockSpec((2, tile_n), lambda i: (0, i)),
                pl.BlockSpec((T, tile_n), lambda i: (0, i)),
                pl.BlockSpec((T * C, H * W), lambda i: (0, 0)),
                pl.BlockSpec((T * C, T), lambda i: (0, 0)),
                pl.BlockSpec((C, T * C), lambda i: (0, 0)),
            ],
            out_specs=pl.BlockSpec((C, tile_n), lambda i: (0, i)),
        ),
        compiler_params=pltpu.CompilerParams(
            dimension_semantics=("parallel",),
            vmem_limit_bytes=32 * 1024 * 1024),
    )(tc_t, mw_t, tex_flat, e_mat, s_mat)

    out = out_t[:, :n].T                           # (n, C)
    return out.reshape(in_shape[:-1] + (C,))


def ref_forward(textures, texcoord, mix_weights):
    """Pure-JAX reference replicating PyTorch grid_sample bilinear/zeros/align_corners=False."""
    T, C, H, W = textures.shape
    tc = texcoord.reshape(-1, 2)
    mw = mix_weights.reshape(-1, T)
    x = tc[:, 0]
    y = tc[:, 1]
    ix = ((x + 1.0) * W - 1.0) * 0.5
    iy = ((y + 1.0) * H - 1.0) * 0.5
    x0 = jnp.floor(ix)
    y0 = jnp.floor(iy)
    fx = ix - x0
    fy = iy - y0

    def gather(xi, yi):
        valid = (xi >= 0) & (xi <= W - 1) & (yi >= 0) & (yi <= H - 1)
        xi_c = jnp.clip(xi, 0, W - 1).astype(jnp.int32)
        yi_c = jnp.clip(yi, 0, H - 1).astype(jnp.int32)
        vals = textures[:, :, yi_c, xi_c]                       # (T, C, N)
        return vals * valid.astype(textures.dtype)

    sampled = (gather(x0, y0) * ((1 - fx) * (1 - fy)) +
               gather(x0 + 1, y0) * (fx * (1 - fy)) +
               gather(x0, y0 + 1) * ((1 - fx) * fy) +
               gather(x0 + 1, y0 + 1) * (fx * fy))              # (T, C, N)
    sampled = sampled.transpose(2, 0, 1)                        # (N, T, C)
    res = (sampled * mw[:, :, None]).sum(1)                     # (N, C)
    return res.reshape(texcoord.shape[:-1] + (C,))


if __name__ == "__main__":
    key = jax.random.PRNGKey(0)
    k_tex, k_tc, k_mix = jax.random.split(key, 3)

    # Small-shape instantiation of the module (channel_count in {3,6,7,10}).
    texture_count, channel_count, resolution = 8, 7, 16
    batch_shape = (2, 128)

    textures = jax.random.normal(
        k_tex, (texture_count, channel_count, resolution, resolution), jnp.float32)
    texcoord = jax.random.uniform(
        k_tc, batch_shape + (2,), jnp.float32, minval=-1.2, maxval=1.2)
    mix_weights = jax.nn.softmax(
        jax.random.normal(k_mix, batch_shape + (texture_count,), jnp.float32), axis=-1)

    ref = ref_forward(textures, texcoord, mix_weights)

    # Default perf path: bf16 matmul operands, f32 accumulation.
    out = jax.block_until_ready(texture_mix_decoder(textures, texcoord, mix_weights))
    assert out.shape == batch_shape + (channel_count,)
    err_bf16 = float(jnp.max(jnp.abs(out - ref)))
    assert err_bf16 < 5e-2, f"bf16 path mismatch vs reference, max_err={err_bf16}"

    # f32 operands: bit-tight check of the sampling / mixing math.
    out_f32 = jax.block_until_ready(
        texture_mix_decoder(textures, texcoord, mix_weights, matmul_dtype=jnp.float32))
    err_f32 = float(jnp.max(jnp.abs(out_f32 - ref)))
    assert err_f32 < 1e-4, f"f32 path mismatch vs reference, max_err={err_f32}"

    print("KERNEL_OK")
</pallas_src>

<mosaic_0001>
module attributes {stable_mosaic.version = 11 : i64} {
  func.func @_texture_mix_kernel(%arg0: i32, %arg1: memref<2x128xf32, #tpu.memory_space<vmem>>, %arg2: memref<8x128xf32, #tpu.memory_space<vmem>>, %arg3: memref<56x256xbf16, #tpu.memory_space<vmem>>, %arg4: memref<56x8xf32, #tpu.memory_space<vmem>>, %arg5: memref<7x56xf32, #tpu.memory_space<vmem>>, %arg6: memref<7x128xf32, #tpu.memory_space<vmem>>) attributes {dimension_semantics = [#tpu.dimension_semantics<parallel>], iteration_bounds = array<i64: 2>, scalar_prefetch = 0 : i64, scratch_operands = 0 : i64, tpu.core_type = #tpu.core_type<tc>, window_params = [{transform_indices = @transform_0, window_bounds = array<i64: 2, 128>}, {transform_indices = @transform_1, window_bounds = array<i64: 8, 128>}, {pipeline_mode = #tpu.pipeline_mode<synchronous>, transform_indices = @transform_2, window_bounds = array<i64: 56, 256>}, {pipeline_mode = #tpu.pipeline_mode<synchronous>, transform_indices = @transform_3, window_bounds = array<i64: 56, 8>}, {pipeline_mode = #tpu.pipeline_mode<synchronous>, transform_indices = @transform_4, window_bounds = array<i64: 7, 56>}, {transform_indices = @transform_5, window_bounds = array<i64: 7, 128>}]} {
    %c0 = arith.constant 0 : index
    %c0_0 = arith.constant 0 : index
    %0 = vector.load %arg1[%c0, %c0_0] : memref<2x128xf32, #tpu.memory_space<vmem>>, vector<1x128xf32>
    %c1 = arith.constant 1 : index
    %c0_1 = arith.constant 0 : index
    %1 = vector.load %arg1[%c1, %c0_1] : memref<2x128xf32, #tpu.memory_space<vmem>>, vector<1x128xf32>
    %cst = arith.constant 1.000000e+00 : f32
    %2 = vector.broadcast %cst : f32 to vector<1x128xf32>
    %3 = arith.addf %0, %2 : vector<1x128xf32>
    %cst_2 = arith.constant 1.600000e+01 : f32
    %4 = vector.broadcast %cst_2 : f32 to vector<1x128xf32>
    %5 = arith.mulf %3, %4 : vector<1x128xf32>
    %cst_3 = arith.constant 1.000000e+00 : f32
    %6 = vector.broadcast %cst_3 : f32 to vector<1x128xf32>
    %7 = arith.subf %5, %6 : vector<1x128xf32>
    %cst_4 = arith.constant 5.000000e-01 : f32
    %8 = vector.broadcast %cst_4 : f32 to vector<1x128xf32>
    %9 = arith.mulf %7, %8 : vector<1x128xf32>
    %cst_5 = arith.constant 1.000000e+00 : f32
    %10 = vector.broadcast %cst_5 : f32 to vector<1x128xf32>
    %11 = arith.addf %1, %10 : vector<1x128xf32>
    %cst_6 = arith.constant 1.600000e+01 : f32
    %12 = vector.broadcast %cst_6 : f32 to vector<1x128xf32>
    %13 = arith.mulf %11, %12 : vector<1x128xf32>
    %cst_7 = arith.constant 1.000000e+00 : f32
    %14 = vector.broadcast %cst_7 : f32 to vector<1x128xf32>
    %15 = arith.subf %13, %14 : vector<1x128xf32>
    %cst_8 = arith.constant 5.000000e-01 : f32
    %16 = vector.broadcast %cst_8 : f32 to vector<1x128xf32>
    %17 = arith.mulf %15, %16 : vector<1x128xf32>
    %18 = math.floor %9 : vector<1x128xf32>
    %19 = math.floor %17 : vector<1x128xf32>
    %20 = arith.subf %9, %18 : vector<1x128xf32>
    %21 = arith.subf %17, %19 : vector<1x128xf32>
    %22 = arith.fptosi %18 : vector<1x128xf32> to vector<1x128xi32>
    %23 = arith.fptosi %19 : vector<1x128xf32> to vector<1x128xi32>
    %24 = tpu.iota {dimensions = array<i32: 0>} : vector<16x1xi32>
    %25 = vector.broadcast %24 : vector<16x1xi32> to vector<16x128xi32>
    %26 = vector.broadcast %22 : vector<1x128xi32> to vector<16x128xi32>
    %27 = arith.subi %25, %26 : vector<16x128xi32>
    %28 = tpu.iota {dimensions = array<i32: 0>} : vector<16x1xi32>
    %29 = vector.broadcast %28 : vector<16x1xi32> to vector<16x128xi32>
    %30 = vector.broadcast %23 : vector<1x128xi32> to vector<16x128xi32>
    %31 = arith.subi %29, %30 : vector<16x128xi32>
    %c0_i32 = arith.constant 0 : i32
    %32 = vector.broadcast %c0_i32 : i32 to vector<16x128xi32>
    %33 = arith.cmpi eq, %27, %32 : vector<16x128xi32>
    %cst_9 = arith.constant 1.000000e+00 : f32
    %34 = vector.broadcast %cst_9 : f32 to vector<1x128xf32>
    %35 = arith.subf %34, %20 : vector<1x128xf32>
    %cst_10 = arith.constant 0.000000e+00 : f32
    %36 = vector.shape_cast %35 : vector<1x128xf32> to vector<1x128xf32>
    %37 = vector.broadcast %36 : vector<1x128xf32> to vector<16x128xf32>
    %38 = vector.broadcast %cst_10 : f32 to vector<16x128xf32>
    %39 = arith.select %33, %37, %38 : vector<16x128xi1>, vector<16x128xf32>
    %c1_i32 = arith.constant 1 : i32
    %40 = vector.broadcast %c1_i32 : i32 to vector<16x128xi32>
    %41 = arith.cmpi eq, %27, %40 : vector<16x128xi32>
    %cst_11 = arith.constant 0.000000e+00 : f32
    %42 = vector.shape_cast %20 : vector<1x128xf32> to vector<1x128xf32>
    %43 = vector.broadcast %42 : vector<1x128xf32> to vector<16x128xf32>
    %44 = vector.broadcast %cst_11 : f32 to vector<16x128xf32>
    %45 = arith.select %41, %43, %44 : vector<16x128xi1>, vector<16x128xf32>
    %46 = arith.addf %39, %45 : vector<16x128xf32>
    %c0_i32_12 = arith.constant 0 : i32
    %47 = vector.broadcast %c0_i32_12 : i32 to vector<16x128xi32>
    %48 = arith.cmpi eq, %31, %47 : vector<16x128xi32>
    %cst_13 = arith.constant 1.000000e+00 : f32
    %49 = vector.broadcast %cst_13 : f32 to vector<1x128xf32>
    %50 = arith.subf %49, %21 : vector<1x128xf32>
    %cst_14 = arith.constant 0.000000e+00 : f32
    %51 = vector.shape_cast %50 : vector<1x128xf32> to vector<1x128xf32>
    %52 = vector.broadcast %51 : vector<1x128xf32> to vector<16x128xf32>
    %53 = vector.broadcast %cst_14 : f32 to vector<16x128xf32>
    %54 = arith.select %48, %52, %53 : vector<16x128xi1>, vector<16x128xf32>
    %c1_i32_15 = arith.constant 1 : i32
    %55 = vector.broadcast %c1_i32_15 : i32 to vector<16x128xi32>
    %56 = arith.cmpi eq, %31, %55 : vector<16x128xi32>
    %cst_16 = arith.constant 0.000000e+00 : f32
    %57 = vector.shape_cast %21 : vector<1x128xf32> to vector<1x128xf32>
    %58 = vector.broadcast %57 : vector<1x128xf32> to vector<16x128xf32>
    %59 = vector.broadcast %cst_16 : f32 to vector<16x128xf32>
    %60 = arith.select %56, %58, %59 : vector<16x128xi1>, vector<16x128xf32>
    %61 = arith.addf %54, %60 : vector<16x128xf32>
    %62 = vector.shape_cast %61 : vector<16x128xf32> to vector<16x1x128xf32>
    %63 = vector.shape_cast %46 : vector<16x128xf32> to vector<1x16x128xf32>
    %64 = vector.broadcast %62 : vector<16x1x128xf32> to vector<16x16x128xf32>
    %65 = vector.broadcast %63 : vector<1x16x128xf32> to vector<16x16x128xf32>
    %66 = arith.mulf %64, %65 : vector<16x16x128xf32>
    %67 = vector.shape_cast %66 : vector<16x16x128xf32> to vector<256x128xf32>
    %c0_17 = arith.constant 0 : index
    %c0_18 = arith.constant 0 : index
    %68 = vector.load %arg3[%c0_17, %c0_18] : memref<56x256xbf16, #tpu.memory_space<vmem>>, vector<56x256xbf16>
    %69 = arith.truncf %67 : vector<256x128xf32> to vector<256x128xbf16>
    %cst_19 = arith.constant dense<0.000000e+00> : vector<56x128xf32>
    %70 = tpu.matmul %68, %69, %cst_19 {dimension_numbers = #tpu.dot_dimension_numbers<[1], [0], [0], [1], [0, 0, 1, 1], [], []>} : vector<56x256xbf16>, vector<256x128xbf16>, vector<56x128xf32> -> vector<56x128xf32>
    %c0_20 = arith.constant 0 : index
    %c0_21 = arith.constant 0 : index
    %71 = vector.load %arg4[%c0_20, %c0_21] : memref<56x8xf32, #tpu.memory_space<vmem>>, vector<56x8xf32>
    %c0_22 = arith.constant 0 : index
    %c0_23 = arith.constant 0 : index
    %72 = vector.load %arg2[%c0_22, %c0_23] : memref<8x128xf32, #tpu.memory_space<vmem>>, vector<8x128xf32>
    %cst_24 = arith.constant dense<0.000000e+00> : vector<56x128xf32>
    %73 = tpu.matmul %71, %72, %cst_24 {dimension_numbers = #tpu.dot_dimension_numbers<[1], [0], [0], [1], [0, 0, 1, 1], [], []>} : vector<56x8xf32>, vector<8x128xf32>, vector<56x128xf32> -> vector<56x128xf32>
    %c0_25 = arith.constant 0 : index
    %c0_26 = arith.constant 0 : index
    %74 = vector.load %arg5[%c0_25, %c0_26] : memref<7x56xf32, #tpu.memory_space<vmem>>, vector<7x56xf32>
    %75 = arith.mulf %70, %73 : vector<56x128xf32>
    %cst_27 = arith.constant dense<0.000000e+00> : vector<7x128xf32>
    %76 = tpu.matmul %74, %75, %cst_27 {dimension_numbers = #tpu.dot_dimension_numbers<[1], [0], [0], [1], [0, 0, 1, 1], [], []>} : vector<7x56xf32>, vector<56x128xf32>, vector<7x128xf32> -> vector<7x128xf32>
    %c0_28 = arith.constant 0 : index
    %c0_29 = arith.constant 0 : index
    %77 = vector.load %arg6[%c0_28, %c0_29] : memref<7x128xf32, #tpu.memory_space<vmem>>, vector<7x128xf32>
    tpu.vector_store %arg6[%c0_28, %c0_29], %76 {strides = array<i32>} : memref<7x128xf32, #tpu.memory_space<vmem>>, vector<7x128xf32>,
    return
  }
  func.func @transform_0(%arg0: i32) -> (i32, i32) {
    %c0_i32 = arith.constant 0 : i32
    %c0_i32_0 = arith.constant 0 : i32
    return %c0_i32, %arg0 : i32, i32
  }
  func.func @transform_1(%arg0: i32) -> (i32, i32) {
    %c0_i32 = arith.constant 0 : i32
    %c0_i32_0 = arith.constant 0 : i32
    return %c0_i32, %arg0 : i32, i32
  }
  func.func @transform_2(%arg0: i32) -> (i32, i32) {
    %c0_i32 = arith.constant 0 : i32
    %c0_i32_0 = arith.constant 0 : i32
    %c0_i32_1 = arith.constant 0 : i32
    return %c0_i32, %c0_i32_0 : i32, i32
  }
  func.func @transform_3(%arg0: i32) -> (i32, i32) {
    %c0_i32 = arith.constant 0 : i32
    %c0_i32_0 = arith.constant 0 : i32
    %c0_i32_1 = arith.constant 0 : i32
    return %c0_i32, %c0_i32_0 : i32, i32
  }
  func.func @transform_4(%arg0: i32) -> (i32, i32) {
    %c0_i32 = arith.constant 0 : i32
    %c0_i32_0 = arith.constant 0 : i32
    %c0_i32_1 = arith.constant 0 : i32
    return %c0_i32, %c0_i32_0 : i32, i32
  }
  func.func @transform_5(%arg0: i32) -> (i32, i32) {
    %c0_i32 = arith.constant 0 : i32
    %c0_i32_0 = arith.constant 0 : i32
    return %c0_i32, %arg0 : i32, i32
  }
}

</mosaic_0001>

<bundles_post_ra>
// kernel: tpu_custom_call.1
= control target key start
LH: loop header
LB: loop body
LE: loop exit
PB: predicated region body
PF: predicated region fallthrough
CT: control target
= control target key end

     0   :  { %10 = vsyncpa [#allocation3], 0  ;;  %s1738_s0 = inlined_call_operand.hbm [shape: f32[2,256], index: 0, kind: input, shape index: {}]   ;;  %s1739_s1 = inlined_call_operand.hbm [shape: f32[8,256], index: 1, kind: input, shape index: {}]   ;;  %s1740_s2 = inlined_call_operand.vmem [shape: bf16[56,256], index: 2, kind: input, shape index: {}]   ;;  %s1741_s3 = inlined_call_operand.vmem [shape: f32[56,8], index: 3, kind: input, shape index: {}]   ;;  %s1742_s4 = inlined_call_operand.vmem [shape: f32[7,56], index: 4, kind: input, shape index: {}]   ;;  %s1743_s5 = inlined_call_operand.hbm [shape: f32[7,256], index: 5, kind: output, shape index: {}]  }
   0x1   :  { %12 = vsyncpa [#allocation3 + $0x1], 0 }
   0x2   :  { %13 = vsyncpa [#allocation6], 0 }
   0x3   :  { %15 = vsyncpa [#allocation6 + $0x1], 0 }
   0x4   :  { %16 = vsyncpa [#allocation4], 0 }
   0x5   :  { %18 = vsyncpa [#allocation4 + $0x1], 0  ;;  %s1380_s18 = smov 0   ;;  %s1382_s19 = smov 0  }
   0x6   :  { %s1384_s20 = smov 0   ;;  %s1386_s21 = smov 0  }
   0x7 LB: > { %s1401_s22 = sadd.s32 4294967295, %s1341_s21   ;;  %s1003_s23 = sadd.s32 4294967294, %s1341_s21   ;;  %s1341_s21 = sphi %s1386_s21, %s1762_s21   ;;  %s1337_s20 = sphi %s1384_s20, %s1761_s20   ;;  %s1333_s19 = sphi %s1382_s19, %s1760_s19   ;;  %s1329_s18 = sphi %s1380_s18, %s1759_s18  }
   0x8   : > { %s1405_s24 = sadd.s32 1, %s1341_s21   ;;  %s31_s25 = sadd.s32 1, %s1337_s20 }
   0x9   : > { %s28_s26 = ssub.s32 %s1341_s21, %s1405_s24  ;;  %p38_p0 = scmp.ne.s32.totalorder %s1337_s20, %s1333_s19 }
   0xa   : > { %p29_p1 = scmp.eq.s32.totalorder %s28_s26, 0  ;;  %p39_p2 = scmp.eq.s32.totalorder %s1341_s21, 0 }
   0xb   : > { %p44_p3 = scmp.ne.s32.totalorder %s1333_s19, %s1329_s18  ;;  %p45_p4 = scmp.eq.s32.totalorder %s1401_s22, 0 }
   0xc   : > { %s1417_s27 = scalar_select %p29_p1, %s1337_s20, %s31_s25  }
   0xd   : > { %p1419_p5 = por %p39_p2, %p38_p0  ;;  %p1423_p6 = por %p45_p4, %p44_p3 }
   0xe   : > { %p157_p7 = scmp.eq.s32.totalorder %s1401_s22, 1  ;;  %p163_p8 = scmp.eq.s32.totalorder %s1003_s23, 1 }
   0xf   : > { %s1747_s29 = scalar_select %p1423_p6, 1, 0 }
  0x10   : > { %p1162_p10 = scmp.lt.s32.totalorder %s1341_s21, 2  ;;  %p1430_p11 = por %p157_p7, %p38_p0 }
  0x11   : > { %p1434_p12 = por %p163_p8, %p44_p3  ;;  %s1439_s7 = sand.u32 1, %s1337_s20  }
  0x12   : > { %s1748_s30 = scalar_select %p1430_p11, 1, 0 }
  0x13   : > { %s1749_s6 = scalar_select %p1434_p12, 1, 0 }
  0x14   : > { %s1007_s8 = sshll.u32 %s1341_s21, 5  ;;  %s1006_s9 = sshll.u32 %s1439_s7, 1 }
  0x15   : > { %s1446_s12 = scalar_lea.hbm %s1738_s0, %s1007_s8  ;;  %s196_s13 = scalar_lea.vmem [#allocation2], %s1006_s9 }
  0x16   : > { %s203_s14 = sshll.u32 %s196_s13, 4  ;;  %p1450_p13 = pnand %p1162_p10, %p1419_p5  ;;  %s1454_s14 = int_to_ptr.vmem [resolvable:$true] %s203_s14 }
  0x17   : > { %s193_s16 = scalar_lea.sflag [#allocation3], %s1439_s7  ;;  %s1211_s17 = scalar_lea.hbm %s1446_s12, 32 }
  0x18   : > { %p1212_p2 = scmp.ne.s32.totalorder %s1446_s12, %s1211_s17  ;;  %p1213_p3 = pneg %p1450_p13 }
  0x19   : > { %s1216_s26 = scalar_lea.hbm %s1738_s0, 64  ;;  %p1217_p5 = scmp.lt.u32.totalorder %s1446_s12, %s1738_s0 }
  0x1a   : > { %p1214_p4 = pnand %p1213_p3, %p1212_p2  ;;  %p1218_p8 = scmp.lt.u32.totalorder %s1216_s26, %s1211_s17 }
  0x1b   : > { %p1220_p9 = scmp.lt.u32.totalorder %s1211_s17, %s1446_s12 }
  0x1c   : > { %p1215_p7 = pneg %p1214_p4  ;;  %p1219_p10 = por %p1218_p8, %p1217_p5 }
  0x1e   : > { %p1221_p0 = por %p1220_p9, %p1219_p10 }
  0x20   : > { %p1222_p1 = pnand %p1221_p0, %p1215_p7 }
  0x22   : > { %1225 = shalt.err (!%p1222_p1)
}
  0x23   : > { %s1226_s9 = scalar_lea.vmem %s1454_s14, 32  ;;  %s1343_s10 = smov [#allocation2]  }
  0x24   : > { %p1227_p2 = scmp.ne.s32.totalorder %s1454_s14, %s1226_s9  ;;  %s1231_s11 = sshll.u32 %s1343_s10, 4  ;;  %s1232_s11 = int_to_ptr.vmem [resolvable:$false] %s1231_s11 }
  0x25   : > { %s1233_s13 = scalar_lea.vmem %s1232_s11, 64  ;;  %p1234_p11 = scmp.lt.s32.totalorder %s1454_s14, %s1232_s11 }
  0x26   : > { %p1229_p4 = pnand %p1227_p2, %p1213_p3  ;;  %p1235_p5 = scmp.lt.s32.totalorder %s1233_s13, %s1226_s9 }
  0x28   : > { %p1230_p12 = pneg %p1229_p4  ;;  %p1236_p8 = por %p1235_p5, %p1234_p11 }
  0x2a   : > { %p1237_p9 = pnand %p1236_p8, %p1230_p12 }
  0x2c   : > { %1240 = shalt.err (!%p1237_p9)
}
  0x2d   : > { %1154 = dma.hbm_to_vmem [thread:$0]  (!%p1450_p13), %s1446_s12, 32, %s1454_s14, %s193_s16  }
  0x2e   : > { %p1751_p0 = scmp.lt.s32.totalorder %s1341_s21, 3  ;;  %p1752_p1 = scmp.ge.s32.totalorder %s1341_s21, 1 }
  0x2f   : > { %s1008_s23 = sshll.u32 %s1439_s7, 3  ;;  %s1009_s25 = sshll.u32 %s1341_s21, 7 }
  0x30   : > { %p1488_p7 = pnand %p1752_p1, %p1751_p0  ;;  %s1497_s8 = scalar_lea.hbm %s1739_s1, %s1009_s25 }
  0x31   : > { %s214_s9 = scalar_lea.vmem [#allocation5], %s1008_s23  ;;  %s211_s12 = scalar_lea.sflag [#allocation6], %s1439_s7 }
  0x32   : > { %s1753_s17 = scalar_select %p1488_p7, 1, 0 }
  0x33   : > { %s221_s10 = sshll.u32 %s214_s9, 4  ;;  %s1241_s14 = scalar_lea.hbm %s1497_s8, 128  ;;  %s222_s10 = int_to_ptr.vmem [resolvable:$true] %s221_s10 }
  0x34   : > { %p1242_p11 = scmp.ne.s32.totalorder %s1497_s8, %s1241_s14  ;;  %s1246_s13 = scalar_lea.hbm %s1739_s1, 256 }
  0x35   : > { %p1247_p2 = scmp.lt.u32.totalorder %s1497_s8, %s1739_s1  ;;  %p1248_p4 = scmp.lt.u32.totalorder %s1246_s13, %s1241_s14 }
  0x36   : > { %p1244_p12 = pnand %p1242_p11, %p1213_p3  ;;  %p1250_p8 = scmp.lt.u32.totalorder %s1241_s14, %s1497_s8 }
  0x37   : > { %p1249_p5 = por %p1248_p4, %p1247_p2 }
  0x38   : > { %p1245_p10 = pneg %p1244_p12 }
  0x39   : > { %p1251_p9 = por %p1250_p8, %p1249_p5 }
  0x3b   : > { %p1252_p0 = pnand %p1251_p9, %p1245_p10 }
  0x3d   : > { %1255 = shalt.err (!%p1252_p0)
}
  0x3e   : > { %s1256_s7 = scalar_lea.vmem %s222_s10, 128  ;;  %s1344_s23 = smov [#allocation5]  }
  0x3f   : > { %p1257_p1 = scmp.ne.s32.totalorder %s222_s10, %s1256_s7  ;;  %s1261_s28 = sshll.u32 %s1344_s23, 4  ;;  %s1262_s28 = int_to_ptr.vmem [resolvable:$false] %s1261_s28 }
  0x40   : > { %s1263_s9 = scalar_lea.vmem %s1262_s28, 256  ;;  %p1264_p6 = scmp.lt.s32.totalorder %s222_s10, %s1262_s28 }
  0x41   : > { %p1259_p11 = pnand %p1257_p1, %p1213_p3  ;;  %p1265_p7 = scmp.lt.s32.totalorder %s1263_s9, %s1256_s7 }
  0x43   : > { %p1260_p12 = pneg %p1259_p11  ;;  %p1266_p2 = por %p1265_p7, %p1264_p6 }
  0x45   : > { %p1267_p4 = pnand %p1266_p2, %p1260_p12 }
  0x47   : > { %1270 = shalt.err (!%p1267_p4)
}
  0x48   : > { %1157 = dma.hbm_to_vmem [thread:$0]  (!%p1450_p13), %s1497_s8, 128, %s222_s10, %s211_s12  }
  0x49   : > { %p1754_p10 = scmp.ne.s32.totalorder %s1753_s17, 0 }
  0x4a   : > { %s1522_s14 = sand.u32 (!%p1754_p10), 1, %s1333_s19   ;;  %p1755_p3 = scmp.ne.s32.totalorder (!%p1754_p10), %s1747_s29, 0 }
  0x4b   : > { %230 = sbr.rel (%p1754_p10) target bundleno = 620 (0x26c), region = 40  ;;  %s1011_s16 = sshll.u32 (!%p1754_p10), %s1522_s14, 1 }
  0x4c   : > { %s233_s11 = scalar_lea.sflag (!%p1754_p10), [#allocation3], %s1522_s14  ;;  %s236_s13 = scalar_lea.vmem (!%p1754_p10), [#allocation2], %s1011_s16 }
  0x52   : > { %1316 = dma.done.wait (%p1755_p3), %s233_s11, 32  }
  0x53   : > { %1318 = vsyncadd (%p1755_p3), %s233_s11, 4294967264  ;;  %s1012_s15 = sshll.u32 %s1522_s14, 3  ;;  %s242_s17 = scalar_lea.sflag [#allocation6], %s1522_s14 }
  0x54   : > { %s245_s8 = scalar_lea.vmem [#allocation5], %s1012_s15 }
  0x55   : > { %1320 = dma.done.wait (%p1755_p3), %s242_s17, 128  }
  0x56   : > { %1322 = vsyncadd (%p1755_p3), %s242_s17, 4294967168  ;;  %v1345_v0 = vmov 0.0   ;;  %vm1346_vm0 = vmmov 0   ;;  %v278_v1 = vld [vmem:[%s236_s13] sm:$0x1]  ;;  %vm691_vm1 = vcmask 64512   ;;  %v294_v6 = vlaneseq }
  0x57   : > { %1092 = vmatprep.subr.mxu1 %v1345_v0  ;;  %1094 = vmatprep.mubr.msk.f32.mxu1 %vm1346_vm0, %v1345_v0  ;;  %v279_v2 = vld [vmem:[%s236_s13 + $0x1] sm:$0x1]  ;;  %v280_v3 = vadd.f32 1.0, %v278_v1  ;;  %v690_v5 = vld [vmem:[%s245_s8] sm:$0xff]  ;;  %v1347_v25 = vmov 1966171168  }
  0x58   : > { %v284_v4 = vadd.f32 1.0, %v279_v2  ;;  %v1202_v7 = vld [vmem:[%s1740_s2 + $0x4] ss:$8 sps:$4 sm:$0xff]   ;;  %1093 = vmatpush3.msra.mxu1 %v690_v5  ;;  %v295_v14 = vshrl.u32 %v294_v6, 7  ;;  %v685_v17 = vld [vmem:[%s1741_s3 + $0x10] sm:$0xff]  ;;  %v351_v26 = vunpack.c.l.s4 %v1347_v25  ;;  %v686_v27 = vld [vmem:[%s1741_s3 + $0x18] sm:$0xff] }
  0x59   : > { %v683_v8 = vld [vmem:[%s1741_s3] sm:$0xff]  ;;  %v281_v9 = vmul.f32 16.0, %v280_v3  ;;  %651 = vmatprep.mubr.bf16.mxu0 %v1202_v7  ;;  %v684_v11 = vld [vmem:[%s1741_s3 + $0x8] sm:$0xff]  ;;  %v689_v57 = vld [vmem:[%s1741_s3 + $0x30] sm:$0xff]  ;;  %vm821_vm10 = vcmask 457728   ;;  %s276_s29 = scalar_lea.vmem [#allocation7], %s1012_s15 }
  0x5a   : > { %v285_v10 = vmul.f32 16.0, %v284_v4  ;;  %1095 = vmatmul.mubr.msk.f32.vlgmr.msra.gmra.mrb[0].mxu1 %vm691_vm1, %v683_v8  ;;  %v1559_v20 = vsub.s32 0, %v295_v14  ;;  %v296_v30 = vadd.s32 8, %v295_v14  ;;  %v352_v35 = vunpack.c.0.s8 %v351_v26  ;;  %v687_v36 = vld [vmem:[%s1741_s3 + $0x20] sm:$0xff]  ;;  %v688_v46 = vld [vmem:[%s1741_s3 + $0x28] sm:$0xff]  ;;  %s910_s25 = sshll.u32 %s276_s29, 4  ;;  %s1691_s25 = int_to_ptr.vmem [resolvable:$true] %s910_s25 }
  0x5b   : > { %1097 = vmatprep.mubr.msk.f32.mxu1 %vm1346_vm0, %v1345_v0  ;;  %v1014_v12 = vadd.f32 -1.0, %v281_v9  ;;  %s1033_s26 = sshll.u32 %s1401_s22, 7  ;;  %s897_s9 = scalar_lea.sflag [#allocation4], %s1522_s14 }
  0x5c   : > { %v1015_v13 = vadd.f32 -1.0, %v285_v10  ;;  %v1580_v45 = vsub.s32 %v352_v35, %v295_v14  ;;  %s1696_s28 = scalar_lea.hbm %s1743_s5, %s1033_s26  ;;  %s1271_s16 = scalar_lea.vmem %s1691_s25, 128 }
  0x5d   : > { %v283_v15 = vmul.f32 0.5, %v1014_v12  ;;  %p1272_p6 = scmp.ne.s32.totalorder %s1691_s25, %s1271_s16  ;;  %p1756_p13 = scmp.ne.s32.totalorder %s1748_s30, 0 }
  0x5e   : > { %v287_v16 = vmul.f32 0.5, %v1015_v13  ;;  %1098 = vmatmul.mubr.msk.f32.gmra.mrb[2].mxu1 %vm691_vm1, %v684_v11  ;;  %s1349_s22 = smov [#allocation7]  }
  0x5f   : > { %1100 = vmatprep.mubr.msk.f32.mxu1 %vm1346_vm0, %v1345_v0  ;;  %v288_v18 = vfloor.f32 %v283_v15  ;;  %p1273_p7 = pnand %p1272_p6, %p1756_p13  ;;  %s1275_s15 = sshll.u32 %s1349_s22, 4  ;;  %s1276_s15 = int_to_ptr.vmem [resolvable:$false] %s1275_s15 }
  0x60   : > { %v289_v19 = vfloor.f32 %v287_v16  ;;  %s1277_s11 = scalar_lea.vmem %s1276_s15, 256  ;;  %p1278_p8 = scmp.lt.s32.totalorder %s1691_s25, %s1276_s15 }
  0x61   : > { %v290_v21 = vsub.f32 %v283_v15, %v288_v18  ;;  %v1141_v23 = vtrunc.f32 %v288_v18  ;;  %p1274_p5 = pneg %p1273_p7  ;;  %p1279_p9 = scmp.lt.s32.totalorder %s1277_s11, %s1271_s16 }
  0x62   : > { %v291_v22 = vsub.f32 %v287_v16, %v289_v19  ;;  %v1143_v24 = vtrunc.f32 %v289_v19  ;;  %1101 = vmatmul.mubr.msk.f32.gmra.mrb[4].mxu1 %vm691_vm1, %v685_v17 }
  0x63   : > { %1103 = vmatprep.mubr.msk.f32.mxu1 %vm1346_vm0, %v1345_v0  ;;  %v1142_v28 = vcvt.f32.s32 %v1141_v23  ;;  %v311_v31 = vsub.f32 1.0, %v290_v21  ;;  %v323_v44 = vrot.slane %v290_v21, %v1559_v20  ;;  %p1280_p0 = por %p1279_p9, %p1278_p8 }
  0x64   : > { %v1144_v29 = vcvt.f32.s32 %v1143_v24  ;;  %v330_v32 = vsub.f32 1.0, %v291_v22  ;;  %v342_v42 = vrot.slane %v291_v22, %v1559_v20 }
  0x65   : > { %v300_v33 = vrot.slane %v1142_v28, %v1559_v20  ;;  %v315_v40 = vrot.slane %v311_v31, %v1559_v20  ;;  %p1281_p1 = pnand %p1280_p0, %p1274_p5 }
  0x66   : > { %v306_v34 = vrot.slane %v1144_v29, %v1559_v20  ;;  %1104 = vmatmul.mubr.msk.f32.gmra.mrb[6].mxu1 %vm691_vm1, %v686_v27  ;;  %v334_v41 = vrot.slane %v330_v32, %v1559_v20 }
  0x67   : > { %1106 = vmatprep.mubr.msk.f32.mxu1 %vm1346_vm0, %v1345_v0  ;;  %v301_v37 = vsub.s32 %v295_v14, %v300_v33  ;;  %v302_v38 = vsub.s32 %v296_v30, %v300_v33 }
  0x68   : > { %v308_v39 = vsub.s32 %v296_v30, %v306_v34  ;;  %v307_v43 = vsub.s32 %v295_v14, %v306_v34 }
  0x69   : > { %vm309_vm2 = vcmp.eq.s32.totalorder %v301_v37, 0  ;;  %vm310_vm3 = vcmp.eq.s32.totalorder %v302_v38, 0  ;;  %vm318_vm4 = vcmp.eq.s32.totalorder %v301_v37, 1  ;;  %vm319_vm5 = vcmp.eq.s32.totalorder %v302_v38, 1 }
  0x6a   : > { %1107 = vmatmul.mubr.msk.f32.gmra.mrb[8].mxu1 %vm691_vm1, %v687_v36  ;;  %v316_v47 = vsel %vm309_vm2, %v315_v40, 0.0  ;;  %vm329_vm6 = vcmp.eq.s32.totalorder %v308_v39, 0  ;;  %vm338_vm7 = vcmp.eq.s32.totalorder %v308_v39, 1  ;;  %vm328_vm8 = vcmp.eq.s32.totalorder %v307_v43, 0 }
  0x6b   : > { %1109 = vmatprep.mubr.msk.f32.mxu1 %vm1346_vm0, %v1345_v0  ;;  %v336_v48 = vsel %vm329_vm6, %v334_v41, 0.0  ;;  %v344_v49 = vsel %vm338_vm7, %v342_v42, 0.0  ;;  %vm337_vm9 = vcmp.eq.s32.totalorder %v307_v43, 1  ;;  %v324_v50 = vsel %vm318_vm4, %v323_v44, 0.0 }
  0x6c   : > { %v346_v51 = vadd.f32 %v344_v49, %v336_v48  ;;  %v335_v52 = vsel %vm328_vm8, %v334_v41, 0.0  ;;  %v343_v53 = vsel %vm337_vm9, %v342_v42, 0.0  ;;  %v317_v54 = vsel %vm310_vm3, %v315_v40, 0.0 }
  0x6d   : > { %v325_v55 = vsel %vm319_vm5, %v323_v44, 0.0  ;;  %v345_v56 = vadd.f32 %v343_v53, %v335_v52  ;;  %v1595_v60 = vadd.f32 %v324_v50, %v316_v47 }
  0x6e   : > { %1110 = vmatmul.mubr.msk.f32.gmra.mrb[10].mxu1 %vm691_vm1, %v688_v46  ;;  %v398_v58 = vcombine.high %v346_v51, %v346_v51  ;;  %v405_v59 = vrot.slane %v346_v51, %v1580_v45  ;;  %v1598_v63 = vadd.f32 %v325_v55, %v317_v54 }
  0x6f   : > { %1112 = vmatprep.mubr.msk.f32.mxu1 %vm1346_vm0, %v1345_v0  ;;  %v349_v61 = vcombine.high %v345_v56, %v345_v56  ;;  %v356_v62 = vrot.slane %v345_v56, %v1580_v45 }
  0x70   : > { %v413_v1 = vcombine.high %v405_v59, %v405_v59  ;;  %v421_v2 = vrot.slane %v405_v59, %v1580_v45  ;;  %v412_v3 = vrot.slane %v398_v58, %v1580_v45 }
  0x71   : > { %v364_v4 = vcombine.high %v356_v62, %v356_v62  ;;  %v372_v5 = vrot.slane %v356_v62, %v1580_v45  ;;  %v363_v6 = vrot.slane %v349_v61, %v1580_v45 }
  0x72   : > { %1113 = vmatmul.mubr.msk.f32.gmra.mrb[12].mxu1 %vm691_vm1, %v689_v57  ;;  %v443_v7 = vcombine.high %v421_v2, %v421_v2  ;;  %v482_v8 = vrot.slane %v421_v2, %v1559_v20  ;;  %v435_v9 = vrot.slane %v413_v1, %v1580_v45  ;;  %v428_v10 = vrot.slane %v412_v3, %v1580_v45 }
  0x73   : > { %1129 = vmatprep.mubr.msk.f32.mxu1 %vm1346_vm0, %v1345_v0  ;;  %v394_v11 = vcombine.high %v372_v5, %v372_v5  ;;  %v450_v12 = vrot.slane %v372_v5, %v1559_v20  ;;  %v386_v13 = vrot.slane %v364_v4, %v1580_v45  ;;  %v1613_v14 = vrot.slane %v363_v6, %v1580_v45 }
  0x74   : > { %v543_v15 = vmul.f32 %v482_v8, %v1595_v60  ;;  %v544_v16 = vmul.f32 %v482_v8, %v1598_v63  ;;  %v486_v17 = vrot.slane %v435_v9, %v1559_v20  ;;  %v490_v18 = vrot.slane %v443_v7, %v1559_v20 }
  0x75   : > { %v527_v19 = vmul.f32 %v450_v12, %v1595_v60  ;;  %v528_v21 = vmul.f32 %v450_v12, %v1598_v63  ;;  %v454_v22 = vrot.slane %v386_v13, %v1559_v20  ;;  %v458_v23 = vrot.slane %v394_v11, %v1559_v20 }
  0x76   : > { %v574_v24 = vpack.c.bf16 %v544_v16, %v543_v15  ;;  %v545_v25 = vmul.f32 %v486_v17, %v1595_v60  ;;  %v546_v26 = vmul.f32 %v486_v17, %v1598_v63  ;;  %v547_v27 = vmul.f32 %v490_v18, %v1595_v60 }
  0x77   : > { %v566_v28 = vpack.c.bf16 %v528_v21, %v527_v19  ;;  %v529_v29 = vmul.f32 %v454_v22, %v1595_v60  ;;  %v530_v30 = vmul.f32 %v454_v22, %v1598_v63  ;;  %v548_v31 = vmul.f32 %v490_v18, %v1598_v63 }
  0x78   : > { %1036 = vmatprep.subr.bf16.mxu0 %v574_v24  ;;  %v575_v32 = vpack.c.bf16 %v546_v26, %v545_v25  ;;  %v531_v33 = vmul.f32 %v458_v23, %v1595_v60  ;;  %v532_v34 = vmul.f32 %v458_v23, %v1598_v63  ;;  %v445_v35 = vcombine.high %v435_v9, %v435_v9 }
  0x79   : > { %1037 = vmatpush3.bf16.msra.mxu0 %v566_v28  ;;  %v567_v36 = vpack.c.bf16 %v530_v30, %v529_v29  ;;  %v396_v37 = vcombine.high %v386_v13, %v386_v13  ;;  %v498_v38 = vrot.slane %v428_v10, %v1559_v20  ;;  %v576_v39 = vpack.c.bf16 %v548_v31, %v547_v27  ;;  %v1203_v28 = vld [vmem:[%s1740_s2 + $0x14] ss:$8 sps:$4 sm:$0xff]   ;;  %v1208_v30 = vld [vmem:[%s1740_s2 + $0x20] ss:$8 sps:$4 sm:$0xff]  }
  0x7a   : > { %1038 = vmatprep.subr.bf16.mxu0 %v575_v32  ;;  %v494_v40 = vrot.slane %v445_v35, %v1559_v20  ;;  %v414_v41 = vcombine.high %v412_v3, %v412_v3  ;;  %v568_v42 = vpack.c.bf16 %v532_v34, %v531_v33  ;;  %v365_v44 = vcombine.high %v363_v6, %v363_v6  ;;  %v565_v29 = vld [vmem:[%s1740_s2 + $0x30] sm:$0xff] }
  0x7b   : > { %v462_v43 = vrot.slane %v396_v37, %v1559_v20  ;;  %v551_v48 = vmul.f32 %v498_v38, %v1595_v60  ;;  %v466_v49 = vrot.slane %v1613_v14, %v1559_v20  ;;  %v552_v52 = vmul.f32 %v498_v38, %v1598_v63 }
  0x7c   : > { %v549_v46 = vmul.f32 %v494_v40, %v1595_v60  ;;  %v550_v47 = vmul.f32 %v494_v40, %v1598_v63  ;;  %v442_v53 = vrot.slane %v414_v41, %v1580_v45  ;;  %v393_v55 = vrot.slane %v365_v44, %v1580_v45 }
  0x7d   : > { %1039 = vmatpush3.bf16.msra.mxu0 %v567_v36  ;;  %v533_v50 = vmul.f32 %v462_v43, %v1595_v60  ;;  %v534_v51 = vmul.f32 %v462_v43, %v1598_v63  ;;  %v444_v56 = vcombine.high %v428_v10, %v428_v10  ;;  %v535_v58 = vmul.f32 %v466_v49, %v1595_v60 }
  0x7e   : > { %1040 = vmatprep.subr.bf16.mxu0 %v576_v39  ;;  %v577_v54 = vpack.c.bf16 %v550_v47, %v549_v46  ;;  %v502_v57 = vrot.slane %v442_v53, %v1559_v20  ;;  %v536_v59 = vmul.f32 %v466_v49, %v1598_v63  ;;  %v578_v62 = vpack.c.bf16 %v552_v52, %v551_v48 }
  0x7f   : > { %v569_v61 = vpack.c.bf16 %v534_v51, %v533_v50  ;;  %v470_v1 = vrot.slane %v393_v55, %v1559_v20  ;;  %v395_v2 = vcombine.high %v1613_v14, %v1613_v14  ;;  %v506_v4 = vrot.slane %v444_v56, %v1559_v20 }
  0x80   : > { %v553_v3 = vmul.f32 %v502_v57, %v1595_v60  ;;  %v554_v45 = vmul.f32 %v502_v57, %v1598_v63  ;;  %v446_v5 = vcombine.high %v442_v53, %v442_v53  ;;  %v570_v6 = vpack.c.bf16 %v536_v59, %v535_v58 }
  0x81   : > { %1041 = vmatpush3.bf16.msra.mxu0 %v568_v42  ;;  %v537_v7 = vmul.f32 %v470_v1, %v1595_v60  ;;  %v538_v8 = vmul.f32 %v470_v1, %v1598_v63  ;;  %v474_v9 = vrot.slane %v395_v2, %v1559_v20  ;;  %v397_v10 = vcombine.high %v393_v55, %v393_v55 }
  0x82   : > { %1042 = vmatprep.subr.bf16.mxu0 %v577_v54  ;;  %v579_v11 = vpack.c.bf16 %v554_v45, %v553_v3  ;;  %v555_v12 = vmul.f32 %v506_v4, %v1595_v60  ;;  %v556_v13 = vmul.f32 %v506_v4, %v1598_v63  ;;  %v510_v14 = vrot.slane %v446_v5, %v1559_v20 }
  0x83   : > { %v571_v15 = vpack.c.bf16 %v538_v8, %v537_v7  ;;  %v539_v16 = vmul.f32 %v474_v9, %v1595_v60  ;;  %v540_v17 = vmul.f32 %v474_v9, %v1598_v63  ;;  %v478_v18 = vrot.slane %v397_v10, %v1559_v20  ;;  %v1200_v20 = vld [vmem:[%s1740_s2] ss:$8 sps:$4 sm:$0xff]  }
  0x84   : > { %v580_v19 = vpack.c.bf16 %v556_v13, %v555_v12  ;;  %v557_v21 = vmul.f32 %v510_v14, %v1595_v60  ;;  %v558_v22 = vmul.f32 %v510_v14, %v1598_v63  ;;  %v1023_v31 = vcombine.high %v565_v29, %v565_v29 }
  0x85   : > { %1043 = vmatpush3.bf16.msra.mxu0 %v569_v61  ;;  %v572_v23 = vpack.c.bf16 %v540_v17, %v539_v16  ;;  %v541_v24 = vmul.f32 %v478_v18, %v1595_v60  ;;  %v542_v25 = vmul.f32 %v478_v18, %v1598_v63  ;;  %v1205_v60 = vld [vmem:[%s1740_s2 + $0x10] ss:$8 sps:$4 sm:$0xff]   ;;  %v1206_v63 = vld [vmem:[%s1740_s2 + $0x24] ss:$8 sps:$4 sm:$0xff]   ;;  %v1022_v32 = vcombine.low %v565_v29, %v565_v29 }
  0x86   : > { %1044 = vmatprep.subr.bf16.mxu0 %v578_v62  ;;  %v581_v26 = vpack.c.bf16 %v558_v22, %v557_v21  ;;  %v1348_v33 = vmov 0.0|0.0   ;;  %v813_v21 = vld [vmem:[%s1742_s4] sm:$0x7f] }
  0x87   : > { %v573_v27 = vpack.c.bf16 %v542_v25, %v541_v24  ;;  %1132 = vmatprep.subr.bf16.mxu1 %v1348_v33 }
  0x89   : > { %1045 = vmatpush3.bf16.msra.mxu0 %v570_v6 }
  0x8a   : > { %1046 = vmatprep.subr.bf16.mxu0 %v579_v11 }
  0x8d   : > { %1047 = vmatpush3.bf16.msra.mxu0 %v571_v15 }
  0x8e   : > { %1048 = vmatprep.subr.bf16.mxu0 %v580_v19 }
  0x91   : > { %1049 = vmatpush3.bf16.msra.mxu0 %v572_v23 }
  0x92   : > { %1050 = vmatprep.subr.bf16.mxu0 %v581_v26 }
  0x95   : > { %1051 = vmatpush3.bf16.msra.mxu0 %v573_v27 }
  0x98   : > { %652 = vmatmul.mubr.bf16.vlgmr.msra.gmra.mrb[0].mxu0 %v1200_v20 }
  0x99   : > { %659 = vmatprep.mubr.bf16.mxu0 %v1203_v28 }
  0xa0   : > { %660 = vmatmul.mubr.bf16.gmra.mrb[4].mxu0 %v1205_v60 }
  0xa1   : > { %667 = vmatprep.mubr.bf16.mxu0 %v1206_v63 }
  0xa8   : > { %668 = vmatmul.mubr.bf16.gmra.mrb[8].mxu0 %v1208_v30 }
  0xa9   : > { %675 = vmatprep.mubr.bf16.mxu0 %v1023_v31 }
  0xb0   : > { %676 = vmatmul.mubr.bf16.gmra.mrb[12].mxu0 %v1022_v32 }
 0x12d   : > { %v779_v34 = vpop.f32.mrb[0].mxu1 }
 0x12e   : > { %v1096_v35 = vpop.f32.mrb[1].mxu1 }
 0x131   : > { %v784_v36 = vpop.f32.mrb[2].mxu1 }
 0x132   : > { %v1099_v37 = vpop.f32.mrb[3].mxu1 }
 0x135   : > { %v789_v38 = vpop.f32.mrb[4].mxu1 }
 0x136   : > { %v1102_v39 = vpop.f32.mrb[5].mxu1 }
 0x139   : > { %v794_v40 = vpop.f32.mrb[6].mxu1 }
 0x13a   : > { %v1105_v41 = vpop.f32.mrb[7].mxu1 }
 0x13d   : > { %v799_v42 = vpop.f32.mrb[8].mxu1 }
 0x13e   : > { %v1108_v43 = vpop.f32.mrb[9].mxu1 }
 0x141   : > { %v804_v44 = vpop.f32.mrb[10].mxu1 }
 0x142   : > { %v1111_v46 = vpop.f32.mrb[11].mxu1 }
 0x145   : > { %v809_v47 = vpop.f32.mrb[12].mxu1 }
 0x146   : > { %v1114_v48 = vpop.f32.mrb[13].mxu1 }
 0x16b   : > { %v1052_v49 = vpop.f32.mrb[0].mxu0 }
 0x16c   : > { %v1053_v50 = vpop.f32.mrb[1].mxu0 }
 0x16d   : > { %v1054_v51 = vadd.f32 %v1053_v50, %v1052_v49  ;;  %v1055_v52 = vpop.f32.mrb[2].mxu0 }
 0x16e   : > { %v1056_v53 = vpop.f32.mrb[3].mxu0 }
 0x16f   : > { %v814_v54 = vmul.f32 %v1054_v51, %v779_v34  ;;  %v1057_v55 = vadd.f32 %v1056_v53, %v1055_v52 }
 0x171   : > { %v815_v56 = vmul.f32 %v1057_v55, %v784_v36 }
 0x173   : > { %v1133_v57 = vpack.c.bf16 %v815_v56, %v814_v54  ;;  %v1058_v58 = vpop.f32.mrb[4].mxu0 }
 0x174   : > { %v1059_v59 = vpop.f32.mrb[5].mxu0 }
 0x175   : > { %v1060_v61 = vadd.f32 %v1059_v59, %v1058_v58  ;;  %v1061_v62 = vpop.f32.mrb[6].mxu0  ;;  %1134 = vmatpush3.bf16.msra.mxu1 %v1133_v57 }
 0x176   : > { %v1062_v1 = vpop.f32.mrb[7].mxu0  ;;  %1135 = vmatprep.subr.bf16.mxu1 %v1348_v33 }
 0x177   : > { %v816_v2 = vmul.f32 %v1060_v61, %v789_v38  ;;  %v1063_v3 = vadd.f32 %v1062_v1, %v1061_v62 }
 0x179   : > { %v817_v45 = vmul.f32 %v1063_v3, %v794_v40 }
 0x17b   : > { %v1136_v4 = vpack.c.bf16 %v817_v45, %v816_v2  ;;  %v1064_v5 = vpop.f32.mrb[8].mxu0 }
 0x17c   : > { %v1065_v6 = vpop.f32.mrb[9].mxu0 }
 0x17d   : > { %v1066_v7 = vadd.f32 %v1065_v6, %v1064_v5  ;;  %v1067_v8 = vpop.f32.mrb[10].mxu0  ;;  %1137 = vmatpush3.bf16.msra.mxu1 %v1136_v4 }
 0x17e   : > { %v1068_v9 = vpop.f32.mrb[11].mxu0  ;;  %1138 = vmatprep.subr.bf16.mxu1 %v1348_v33 }
 0x17f   : > { %v818_v10 = vmul.f32 %v1066_v7, %v799_v42  ;;  %v1069_v11 = vadd.f32 %v1068_v9, %v1067_v8 }
 0x181   : > { %v819_v12 = vmul.f32 %v1069_v11, %v804_v44 }
 0x183   : > { %v1139_v13 = vpack.c.bf16 %v819_v12, %v818_v10  ;;  %v1070_v14 = vpop.f32.mrb[12].mxu0 }
 0x184   : > { %v1071_v15 = vpop.f32.mrb[13].mxu0 }
 0x185   : > { %v1072_v16 = vadd.f32 %v1071_v15, %v1070_v14  ;;  %v1073_v17 = vpop.f32.mrb[14].mxu0  ;;  %1140 = vmatpush3.bf16.msra.mxu1 %v1139_v13 }
 0x186   : > { %v1074_v18 = vpop.f32.mrb[15].mxu0  ;;  %1127 = vmatprep.subr.mxu1 %v1345_v0 }
 0x187   : > { %v820_v19 = vmul.f32 %v1072_v16, %v809_v47 }
 0x189   : > { %1128 = vmatpush3.msra.mxu1 %v820_v19 }
 0x18a   : > { %1130 = vmatmul.mubr.msk.f32.vlgmr.msra.gmra.mrb[14].mxu1 %vm821_vm10, %v813_v21 }
 0x25d   : > { %v891_v0 = vpop.f32.mrb[14].mxu1 }
 0x25e   : > { %895 = vst [vmem:[%s276_s29] sm:$0x7f] %v891_v0  ;;  %v1131_v22 = vpop.f32.mrb[15].mxu1 }
 0x25f   : > { %1284 = shalt.err (!%p1281_p1)
}
 0x260   : > { %s1285_s14 = scalar_lea.hbm %s1696_s28, 128  ;;  %s1289_s8 = scalar_lea.hbm %s1743_s5, 256 }
 0x261   : > { %p1286_p11 = scmp.ne.s32.totalorder %s1696_s28, %s1285_s14  ;;  %p1290_p4 = scmp.lt.u32.totalorder %s1696_s28, %s1743_s5 }
 0x262   : > { %p1291_p10 = scmp.lt.u32.totalorder %s1289_s8, %s1285_s14  ;;  %p1293_p6 = scmp.lt.u32.totalorder %s1285_s14, %s1696_s28 }
 0x263   : > { %p1287_p12 = pnand %p1286_p11, %p1756_p13 }
 0x264   : > { %p1292_p3 = por %p1291_p10, %p1290_p4 }
 0x265   : > { %p1288_p2 = pneg %p1287_p12 }
 0x266   : > { %p1294_p7 = por %p1293_p6, %p1292_p3 }
 0x268   : > { %p1295_p5 = pnand %p1294_p7, %p1288_p2 }
 0x26a   : > { %1298 = shalt.err (!%p1295_p5)
}
 0x26b   : > { %1149 = dma.vmem_to_hbm [thread:$0]  (%p1756_p13), %s1691_s25, 128, %s1696_s28, %s897_s9  }
 0x26c PF: > { %s922_s29 = sand.u32 1, %s1329_s18   ;;  %p1757_p8 = scmp.ne.s32.totalorder %s1749_s6, 0 }
 0x26d   : > { %p1758_p9 = scmp.ge.s32.totalorder %s1341_s21, 2  ;;  %s923_s26 = scalar_lea.sflag [#allocation4], %s922_s29 }
 0x26f   : > { %p1159_p0 = pnand %p1758_p9, %p1757_p8 }
 0x271   : > { %1324 = dma.done.wait (!%p1159_p0), %s923_s26, 128  }
 0x272   : > { %1326 = vsyncadd (!%p1159_p0), %s923_s26, 4294967168  ;;  %p21_p1 = scmp.ge.s32.totalorder %s1405_s24, 4   ;;  %s1759_s18 = smov %s1333_s19 }
 0x273   : > { %s1760_s19 = smov %s1337_s20  ;;  %s1761_s20 = smov %s1417_s27 }
 0x274   : > { %s1762_s21 = smov %s1405_s24  ;;  %23 = sbr.rel (!%p21_p1) target bundleno = 7 (0x7), region = 98 }
 0x27b   :  { %928 = vsyncpa [#allocation3], 1 }
 0x27c   :  { %930 = vsyncpa [#allocation3 + $0x1], 1 }
 0x27d   :  { %931 = vsyncpa [#allocation6], 1 }
 0x27e   :  { %933 = vsyncpa [#allocation6 + $0x1], 1 }
 0x27f   :  { %934 = vsyncpa [#allocation4], 1 }
 0x280   :  { %936 = vsyncpa [#allocation4 + $0x1], 1 }

</bundles_post_ra>
